<compile_context>
chip_gen: v6e
topology: v6e:2x2x1
jax: 0.10.0
libtpu: 0.0.40
codegen_flags: <defaults>
</compile_context>

<pallas_src>
import math

import jax
import jax.numpy as jnp
from jax.experimental import pallas as pl
from jax.experimental.pallas import tpu as pltpu

_INV_SQRT2 = 1.0 / math.sqrt(2.0)


def _gelu_exact(y):
    # Exact (erf-based) GELU, matching torch.nn.GELU / HF ACT2FN["gelu"].
    return 0.5 * y * (1.0 + jax.lax.erf(y * _INV_SQRT2))


def _fused_kernel(x_ref, w_ref, b_ref, o_ref):
    # K unsplit: one MXU pass per tile; bias + GELU fused into the store.
    y = jnp.dot(x_ref[...].astype(w_ref.dtype), w_ref[...],
                preferred_element_type=jnp.float32)
    y = y + b_ref[...]                       # bias already f32
    o_ref[...] = _gelu_exact(y).astype(o_ref.dtype)


def _ksplit_kernel(x_ref, w_ref, b_ref, o_ref, acc_ref):
    # K split across an "arbitrary" innermost grid axis with an f32 accumulator.
    k = pl.program_id(2)

    @pl.when(k == 0)
    def _():
        acc_ref[...] = jnp.zeros_like(acc_ref)

    acc_ref[...] += jnp.dot(x_ref[...].astype(w_ref.dtype), w_ref[...],
                            preferred_element_type=jnp.float32)

    @pl.when(k == pl.num_programs(2) - 1)
    def _():
        y = acc_ref[...] + b_ref[...]
        o_ref[...] = _gelu_exact(y).astype(o_ref.dtype)


def intermediate_forward(hidden_states, weight_t, bias, *,
                         matmul_dtype=jnp.bfloat16,
                         tm_target=256, tn_target=512,
                         vmem_budget_bytes=48 * 1024 * 1024,
                         tk_override=None):
    """GELU(x @ W^T + b).

    hidden_states: [B, S, H]
    weight_t:      [H, 4H]   (pre-transposed nn.Linear weight, done once)
    bias:          [4H]
    """
    B, S, H = hidden_states.shape
    H4 = weight_t.shape[1]
    M = B * S

    x2d = hidden_states.reshape(M, H)
    # One-time cast: halves weight HBM/VMEM bytes + enables bf16-native MXU.
    w = weight_t.astype(matmul_dtype)
    bias2d = bias.reshape(1, H4).astype(jnp.float32)
    out_dtype = hidden_states.dtype

    x_bytes = jnp.dtype(x2d.dtype).itemsize
    w_bytes = jnp.dtype(w.dtype).itemsize
    o_bytes = jnp.dtype(out_dtype).itemsize

    # ---- Tile sizes (MXU-granular M, lane-dense N). ----
    tm = M if M <= tm_target else max(128, (tm_target // 128) * 128)
    tn = H4 if H4 <= tn_target else max(128, (tn_target // 128) * 128)

    def _fits(tk_, with_acc):
        # Double-buffered inputs/outputs (+ single f32 accumulator if K-split).
        buf = 2 * (tm * tk_ * x_bytes + tk_ * tn * w_bytes
                   + tn * 4 + tm * tn * o_bytes)
        if with_acc:
            buf += tm * tn * 4
        return buf <= vmem_budget_bytes

    if tk_override is not None:
        tk = tk_override
    elif _fits(H, with_acc=False):
        tk = H                                   # K unsplit -> fused epilogue
    else:
        tk = None
        for cand in (2048, 1024, 512, 256, 128):
            if H % cand == 0 and _fits(cand, with_acc=True):
                tk = cand
                break
        if tk is None:
            # TODO(synk): huge H without a 128-multiple divisor that fits; fall
            # back to unsplit K and rely on vmem_limit headroom.
            tk = H

    nm, nn, nk = pl.cdiv(M, tm), pl.cdiv(H4, tn), pl.cdiv(H, tk)

    if nk == 1:
        # Keep resident whichever operand would otherwise generate more repeat
        # HBM reads; the other one streams along the inner grid axis.
        extra_w_bytes = (nm - 1) * H * H4 * w_bytes   # cost if x stays resident
        extra_x_bytes = (nn - 1) * M * H * x_bytes    # cost if W stays resident
        x_resident = extra_w_bytes <= extra_x_bytes
        if x_resident:
            grid = (nm, nn)      # inner axis = N; x tile constant over it
            in_specs = [
                pl.BlockSpec((tm, H), lambda i, j: (i, 0)),
                pl.BlockSpec((H, tn), lambda i, j: (0, j)),
                pl.BlockSpec((1, tn), lambda i, j: (0, j)),
            ]
            out_spec = pl.BlockSpec((tm, tn), lambda i, j: (i, j))
        else:
            grid = (nn, nm)      # inner axis = M; weight tile constant over it
            in_specs = [
                pl.BlockSpec((tm, H), lambda j, i: (i, 0)),
                pl.BlockSpec((H, tn), lambda j, i: (0, j)),
                pl.BlockSpec((1, tn), lambda j, i: (0, j)),
            ]
            out_spec = pl.BlockSpec((tm, tn), lambda j, i: (i, j))
        kernel = _fused_kernel
        scratch_shapes = []
        dim_sem = ("parallel", "parallel")
        x_reads, w_reads = (1, nm) if x_resident else (nn, 1)
    else:
        grid = (nm, nn, nk)      # reduction axis innermost; output resident
        in_specs = [
            pl.BlockSpec((tm, tk), lambda i, j, k: (i, k)),
            pl.BlockSpec((tk, tn), lambda i, j, k: (k, j)),
            pl.BlockSpec((1, tn), lambda i, j, k: (0, j)),
        ]
        out_spec = pl.BlockSpec((tm, tn), lambda i, j, k: (i, j))
        kernel = _ksplit_kernel
        scratch_shapes = [pltpu.VMEM((tm, tn), jnp.float32)]
        dim_sem = ("parallel", "parallel", "arbitrary")
        x_reads, w_reads = nn, nm

    cost = pl.CostEstimate(
        flops=2 * M * H * H4,
        transcendentals=0,   # erf lowers to a VPU polynomial, not the EUP
        bytes_accessed=(x_reads * M * H * x_bytes
                        + w_reads * H * H4 * w_bytes
                        + H4 * 4
                        + M * H4 * o_bytes),
    )

    out2d = pl.pallas_call(
        kernel,
        out_shape=jax.ShapeDtypeStruct((M, H4), out_dtype),
        grid_spec=pltpu.PrefetchScalarGridSpec(
            num_scalar_prefetch=0,
            grid=grid,
            in_specs=in_specs,
            out_specs=out_spec,
            scratch_shapes=scratch_shapes,
        ),
        compiler_params=pltpu.CompilerParams(
            dimension_semantics=dim_sem,
            vmem_limit_bytes=int(vmem_budget_bytes),
        ),
        cost_estimate=cost,
    )(x2d, w, bias2d)

    return out2d.reshape(B, S, H4)


def _reference(hidden_states, weight_t, bias, matmul_dtype=jnp.bfloat16):
    # Mirrors the kernel's matmul precision (bf16 inputs, f32 accumulate) so
    # the assertion is tight and meaningful.
    B, S, H = hidden_states.shape
    H4 = weight_t.shape[1]
    x = hidden_states.reshape(B * S, H).astype(matmul_dtype)
    w = weight_t.astype(matmul_dtype)
    y = jnp.dot(x, w, preferred_element_type=jnp.float32)
    y = y + bias.astype(jnp.float32)[None, :]
    y = 0.5 * y * (1.0 + jax.lax.erf(y * _INV_SQRT2))
    return y.reshape(B, S, H4).astype(hidden_states.dtype)


if __name__ == "__main__":
    key = jax.random.PRNGKey(0)

    # ---- Small config matching the module (kernel_size = hidden = 32). ----
    B, S, H = 2, 8, 32
    H4 = H * 4
    kx, kw, kb, key = jax.random.split(key, 4)
    hidden_states = jax.random.normal(kx, (B, S, H), dtype=jnp.float32)
    bound = 1.0 / math.sqrt(H)
    # PyTorch Linear layout: weight [4H, H], bias [4H]; transpose once.
    weight = jax.random.uniform(kw, (H4, H), minval=-bound, maxval=bound,
                                dtype=jnp.float32)
    bias = jax.random.uniform(kb, (H4,), minval=-bound, maxval=bound,
                              dtype=jnp.float32)
    weight_t = weight.T

    out = jax.block_until_ready(intermediate_forward(hidden_states, weight_t, bias))
    ref = _reference(hidden_states, weight_t, bias)
    assert jnp.allclose(out, ref, atol=1e-3, rtol=1e-3), "mismatch (small config)"

    # ---- Larger config: exercises M/N tiling, partial M tile, and the
    #      weight-resident grid order (re-read traffic favors W residency). ----
    B2, S2, H2 = 2, 264, 256          # M = 528 -> 3 M-tiles (one partial)
    H42 = H2 * 4                      # 1024   -> 2 N-tiles of 512
    kx, kw, kb, key = jax.random.split(key, 4)
    hs2 = jax.random.normal(kx, (B2, S2, H2), dtype=jnp.float32)
    bound2 = 1.0 / math.sqrt(H2)
    w2 = jax.random.uniform(kw, (H42, H2), minval=-bound2, maxval=bound2,
                            dtype=jnp.float32)
    b2 = jax.random.uniform(kb, (H42,), minval=-bound2, maxval=bound2,
                            dtype=jnp.float32)
    w2_t = w2.T

    out2 = jax.block_until_ready(intermediate_forward(hs2, w2_t, b2))
    ref2 = _reference(hs2, w2_t, b2)
    assert jnp.allclose(out2, ref2, atol=1e-3, rtol=1e-3), "mismatch (tiled config)"

    # ---- Same config, forced K-split (tk=128) to validate the accumulator
    #      path used for large-H shapes on v7x. ----
    out3 = jax.block_until_ready(
        intermediate_forward(hs2, w2_t, b2, tk_override=128))
    assert jnp.allclose(out3, ref2, atol=1e-3, rtol=1e-3), "mismatch (K-split)"

    print("KERNEL_OK")
</pallas_src>

<mosaic_0001>
module attributes {stable_mosaic.version = 11 : i64} {
  func.func @_fused_kernel(%arg0: i32, %arg1: i32, %arg2: memref<16x32xf32, #tpu.memory_space<vmem>>, %arg3: memref<32x128xbf16, #tpu.memory_space<vmem>>, %arg4: memref<1x128xf32, #tpu.memory_space<vmem>>, %arg5: memref<16x128xf32, #tpu.memory_space<vmem>>) attributes {dimension_semantics = [#tpu.dimension_semantics<parallel>, #tpu.dimension_semantics<parallel>], iteration_bounds = array<i64: 1, 1>, scalar_prefetch = 0 : i64, scratch_operands = 0 : i64, tpu.core_type = #tpu.core_type<tc>, window_params = [{transform_indices = @transform_0, window_bounds = array<i64: 16, 32>}, {transform_indices = @transform_1, window_bounds = array<i64: 32, 128>}, {transform_indices = @transform_2, window_bounds = array<i64: 1, 128>}, {transform_indices = @transform_3, window_bounds = array<i64: 16, 128>}]} {
    %c0 = arith.constant 0 : index
    %c0_0 = arith.constant 0 : index
    %0 = vector.load %arg2[%c0, %c0_0] : memref<16x32xf32, #tpu.memory_space<vmem>>, vector<16x32xf32>
    %1 = arith.truncf %0 : vector<16x32xf32> to vector<16x32xbf16>
    %c0_1 = arith.constant 0 : index
    %c0_2 = arith.constant 0 : index
    %2 = vector.load %arg3[%c0_1, %c0_2] : memref<32x128xbf16, #tpu.memory_space<vmem>>, vector<32x128xbf16>
    %cst = arith.constant dense<0.000000e+00> : vector<16x128xf32>
    %3 = tpu.matmul %1, %2, %cst {dimension_numbers = #tpu.dot_dimension_numbers<[1], [0], [0], [1], [0, 0, 1, 1], [], []>} : vector<16x32xbf16>, vector<32x128xbf16>, vector<16x128xf32> -> vector<16x128xf32>
    %c0_3 = arith.constant 0 : index
    %c0_4 = arith.constant 0 : index
    %4 = vector.load %arg4[%c0_3, %c0_4] : memref<1x128xf32, #tpu.memory_space<vmem>>, vector<1x128xf32>
    %5 = vector.broadcast %4 : vector<1x128xf32> to vector<16x128xf32>
    %6 = arith.addf %3, %5 : vector<16x128xf32>
    %cst_5 = arith.constant 5.000000e-01 : f32
    %7 = vector.broadcast %cst_5 : f32 to vector<16x128xf32>
    %8 = arith.mulf %7, %6 : vector<16x128xf32>
    %cst_6 = arith.constant 0.707106769 : f32
    %9 = vector.broadcast %cst_6 : f32 to vector<16x128xf32>
    %10 = arith.mulf %6, %9 : vector<16x128xf32>
    %11 = math.erf %10 : vector<16x128xf32>
    %cst_7 = arith.constant 1.000000e+00 : f32
    %12 = vector.broadcast %cst_7 : f32 to vector<16x128xf32>
    %13 = arith.addf %12, %11 : vector<16x128xf32>
    %14 = arith.mulf %8, %13 : vector<16x128xf32>
    %c0_8 = arith.constant 0 : index
    %c0_9 = arith.constant 0 : index
    %15 = vector.load %arg5[%c0_8, %c0_9] : memref<16x128xf32, #tpu.memory_space<vmem>>, vector<16x128xf32>
    tpu.vector_store %arg5[%c0_8, %c0_9], %14 {strides = array<i32>} : memref<16x128xf32, #tpu.memory_space<vmem>>, vector<16x128xf32>,
    return
  }
  func.func @transform_0(%arg0: i32, %arg1: i32) -> (i32, i32) {
    %c0_i32 = arith.constant 0 : i32
    %c0_i32_0 = arith.constant 0 : i32
    return %arg0, %c0_i32 : i32, i32
  }
  func.func @transform_1(%arg0: i32, %arg1: i32) -> (i32, i32) {
    %c0_i32 = arith.constant 0 : i32
    %c0_i32_0 = arith.constant 0 : i32
    return %c0_i32, %arg1 : i32, i32
  }
  func.func @transform_2(%arg0: i32, %arg1: i32) -> (i32, i32) {
    %c0_i32 = arith.constant 0 : i32
    %c0_i32_0 = arith.constant 0 : i32
    return %c0_i32, %arg1 : i32, i32
  }
  func.func @transform_3(%arg0: i32, %arg1: i32) -> (i32, i32) {
    %c0_i32 = arith.constant 0 : i32
    return %arg0, %arg1 : i32, i32
  }
}

</mosaic_0001>

<bundles_post_ra>
// kernel: tpu_custom_call.1
= control target key start
LH: loop header
LB: loop body
LE: loop exit
PB: predicated region body
PF: predicated region fallthrough
CT: control target
= control target key end

     0   :  { %8 = vsyncpa [#allocation3], 0  ;;  %s288_s0 = inlined_call_operand.hbm [shape: f32[16,32], index: 0, kind: input, shape index: {}]   ;;  %s289_s1 = inlined_call_operand.hbm [shape: bf16[32,128], index: 1, kind: input, shape index: {}]   ;;  %s290_s2 = inlined_call_operand.vmem [shape: f32[1,128], index: 2, kind: input, shape index: {}]   ;;  %s291_s3 = inlined_call_operand.hbm [shape: f32[16,128], index: 3, kind: output, shape index: {}]  }
   0x1   :  { %9 = vsyncpa [#allocation6], 0 }
   0x2   :  { %10 = vsyncpa [#allocation4], 0  ;;  %s241_s12 = smov [#allocation2]  }
   0x3   :  { %s16_s13 = sshll.u32 %s241_s12, 4  ;;  %s17_s13 = int_to_ptr.vmem [resolvable:$true] %s16_s13 }
   0x4   :  { %s183_s14 = scalar_lea.vmem %s17_s13, 256  ;;  %p188_p1 = scmp.lt.s32.totalorder %s17_s13, %s17_s13 }
   0x5   :  { %p184_p0 = scmp.ne.s32.totalorder %s17_s13, %s183_s14  ;;  %p189_p2 = scmp.lt.s32.totalorder %s183_s14, %s183_s14 }
   0x7   :  { %p190_p3 = por %p189_p2, %p188_p1 }
   0x9   :  { %p191_p4 = pnand %p190_p3, %p184_p0 }
   0xb   :  { %194 = shalt.err (!%p191_p4)
}
   0xc   :  { %s242_s15 = smov 128   ;;  %s243_s16 = smov 8  }
   0xd   :  { %22 = dma.hbm_to_vmem [thread:$0]  %s288_s0, 256, %s17_s13, [#allocation3], %s242_s15, %s242_s15, %s243_s16  }
   0xe   :  { %s244_s19 = smov [#allocation5]  }
   0xf   :  { %s28_s20 = sshll.u32 %s244_s19, 4  ;;  %s29_s20 = int_to_ptr.vmem [resolvable:$true] %s28_s20 }
  0x10   :  { %s203_s21 = scalar_lea.vmem %s29_s20, 256  ;;  %p208_p6 = scmp.lt.s32.totalorder %s29_s20, %s29_s20 }
  0x11   :  { %p204_p5 = scmp.ne.s32.totalorder %s29_s20, %s203_s21  ;;  %p209_p7 = scmp.lt.s32.totalorder %s203_s21, %s203_s21 }
  0x13   :  { %p210_p8 = por %p209_p7, %p208_p6 }
  0x15   :  { %p211_p9 = pnand %p210_p8, %p204_p5 }
  0x17   :  { %214 = shalt.err (!%p211_p9)
}
  0x18   :  { %s245_s22 = smov 64   ;;  %s246_s23 = smov 4  }
  0x19   :  { %34 = dma.hbm_to_vmem [thread:$0]  %s289_s1, 256, %s29_s20, [#allocation6], %s245_s22, %s245_s22, %s246_s23  }
  0x1a   :  { %235 = dma.done.wait [#allocation3], 256  }
  0x1b   :  { %236 = vsyncadd [#allocation3], 4294967040 }
  0x1c   :  { %237 = dma.done.wait [#allocation6], 256  }
  0x1d   :  { %238 = vsyncadd [#allocation6], 4294967040  ;;  %v247_v0 = vmov 0.0   ;;  %vm248_vm0 = vmmov 0   ;;  %v169_v1 = vld [vmem:[#allocation5 + $0x8] sm:$0xff]   ;;  %v170_v2 = vld [vmem:[#allocation5] sm:$0xff]  }
  0x1e   :  { %152 = vmatprep.subr.bf16.mxu0 %v247_v0  ;;  %156 = vmatprep.mubr.msk.bf16.mxu0 %vm248_vm0, %v247_v0  ;;  %v44_v3 = vld [vmem:[#allocation2] sm:$0xff]  ;;  %v45_v4 = vld [vmem:[#allocation2 + $0x8] sm:$0xff]  ;;  %vm70_vm1 = vcmask 261120   ;;  %s249_s26 = smov [#allocation7]  }
  0x1f   :  { %153 = vmatpush3.bf16.msra.mxu0 %v169_v1  ;;  %v46_v5 = vpack.c.bf16 %v45_v4, %v44_v3  ;;  %v145_v6 = vld [vmem:[%s290_s2] ss:$0 sm:$0xff]  ;;  %s132_s27 = sshll.u32 %s249_s26, 4  ;;  %s133_s27 = int_to_ptr.vmem [resolvable:$true] %s132_s27 }
  0x20   :  { %154 = vmatprep.subr.bf16.mxu0 %v247_v0  ;;  %s215_s2 = scalar_lea.vmem %s133_s27, 256  ;;  %p220_p11 = scmp.lt.s32.totalorder %s133_s27, %s133_s27 }
  0x21   :  { %p216_p10 = scmp.ne.s32.totalorder %s133_s27, %s215_s2  ;;  %p221_p12 = scmp.lt.s32.totalorder %s215_s2, %s215_s2 }
  0x23   :  { %155 = vmatpush3.bf16.msra.mxu0 %v170_v2  ;;  %p222_p13 = por %p221_p12, %p220_p11 }
  0x25   :  { %p223_p0 = pnand %p222_p13, %p216_p10 }
  0x26   :  { %157 = vmatmul.mubr.msk.bf16.vlgmr.msra.gmra.mxu0 %vm70_vm1, %v46_v5 }
  0xe6   :  { %v108_v7 = vpop.f32.mrf.mxu0 }
  0xe7   :  { %v109_v8 = vadd.f32 %v145_v6, %v108_v7 }
  0xe8   :  { %v158_v9 = vpop.f32.mrf.mxu0 }
  0xe9   :  { %v117_v10 = vmul.f32 0.70710677, %v109_v8  ;;  %v115_v16 = vmul.f32 0.5, %v109_v8 }
  0xea   :  { %v111_v11 = vpop.f32.mrf.mxu0 }
  0xeb   :  { %171 = verf.f32 %v117_v10  ;;  %v112_v12 = vadd.f32 %v145_v6, %v111_v11 }
  0xec   :  { %v159_v13 = vpop.f32.mrf.mxu0 }
  0xed   :  { %v118_v14 = vmul.f32 0.70710677, %v112_v12  ;;  %v116_v20 = vmul.f32 0.5, %v112_v12 }
  0xef   :  { %173 = verf.f32 %v118_v14 }
  0xf8   :  { %v172_v15 = vpop.eup %171 }
  0xf9   :  { %v121_v17 = vadd.f32 1.0, %v172_v15 }
  0xfb   :  { %v123_v18 = vmul.f32 %v121_v17, %v115_v16 }
  0xfc   :  { %v174_v19 = vpop.eup %173 }
  0xfd   :  { %125 = vst [vmem:[#allocation7] sm:$0xff] %v123_v18  ;;  %v122_v21 = vadd.f32 1.0, %v174_v19 }
  0xff   :  { %v124_v22 = vmul.f32 %v122_v21, %v116_v20 }
 0x101   :  { %126 = vst [vmem:[#allocation7 + $0x8] sm:$0xff] %v124_v22 }
 0x102   :  { %226 = shalt.err (!%p223_p0)
}
 0x103   :  { %138 = dma.vmem_to_hbm [thread:$0]  %s133_s27, 256, %s291_s3, [#allocation4], %s242_s15, %s242_s15, %s243_s16  }
 0x104   :  { %239 = dma.done.wait [#allocation4], 256  }
 0x105   :  { %240 = vsyncadd [#allocation4], 4294967040 }
 0x106   :  { %142 = vsyncpa [#allocation3], 1 }
 0x107   :  { %143 = vsyncpa [#allocation6], 1 }
 0x108   :  { %144 = vsyncpa [#allocation4], 1 }

</bundles_post_ra>
